<compile_context>
chip_gen: v7x
topology: tpu7x:2x2x1
jax: 0.10.0
libtpu: 0.0.40
codegen_flags: <defaults>
</compile_context>

<pallas_src>
import functools
import math

import jax
import jax.numpy as jnp
from jax import lax
from jax.experimental import pallas as pl
from jax.experimental.pallas import tpu as pltpu

ALPHA = 3.0                      # module default alpha=3
GAMMA = 2                        # module default gamma=2 (explicit squares)
SMOOTH = 1e-6                    # module hard-codes self.smooth = 1e-06
LOG_SMOOTH = math.log(SMOOTH)
LOG_1M_SMOOTH = math.log(1.0 - SMOOTH)

LANES = 128
TILE_R = 4096                    # rows / grid step  (~4 MiB f32+i32 per step)
STRIP_R = 512                    # rows / in-kernel strip (bounds VMEM temps)


def _focal_kernel(x_ref, t_ref, partial_ref, *, count, tile_r, strip_r,
                  needs_mask):
    """One (tile_r, 128) tile -> one (1, 1, 128) lane-dense partial sum."""
    n_strips = tile_r // strip_r
    base_row = pl.program_id(0) * tile_r

    def strip_body(s, acc):
        r0 = pl.multiple_of(s * strip_r, strip_r)
        x = x_ref[pl.ds(r0, strip_r), :].astype(jnp.float32)
        t = t_ref[pl.ds(r0, strip_r), :]

        if needs_mask:
            row = (base_row + r0
                   + lax.broadcasted_iota(jnp.int32, (strip_r, LANES), 0))
            lane = lax.broadcasted_iota(jnp.int32, (strip_r, LANES), 1)
            valid = row * LANES + lane < count
            x = jnp.where(valid, x, 0.0)        # sanitize padded/stale lanes

        # Shared transcendentals: e = exp(-|x|), L = log1p(e) feed sigmoid,
        # log(prob) and softplus(x).  Single divide for 1/(1+e).
        abs_x = jnp.abs(x)
        e = jnp.exp(-abs_x)
        L = jnp.log1p(e)
        r = 1.0 / (1.0 + e)
        prob = jnp.where(x >= 0.0, r, e * r)                  # sigmoid(x)
        prob = jnp.clip(prob, SMOOTH, 1.0 - SMOOTH)

        # log(clamp(sigmoid(x), s, 1-s)) == clamp(log_sigmoid(x), log s, log(1-s))
        log_prob = jnp.clip(jnp.minimum(x, 0.0) - L, LOG_SMOOTH, LOG_1M_SMOOTH)
        softplus_x = jnp.maximum(x, 0.0) + L                  # = -log_sigmoid(-x)

        one_m_p = 1.0 - prob
        pos_term = -(one_m_p * one_m_p) * log_prob            # (1-p)^2 * -log p
        neg_term = ALPHA * (prob * prob) * softplus_x         # a * p^2 * softplus

        loss = jnp.where(t == 1, pos_term,
                         jnp.where(t == 0, neg_term, 0.0))
        if needs_mask:
            loss = jnp.where(valid, loss, 0.0)

        return acc + jnp.sum(loss, axis=0, keepdims=True)     # (1, 128)

    acc = lax.fori_loop(0, n_strips, strip_body,
                        jnp.zeros((1, LANES), jnp.float32), unroll=True)
    partial_ref[...] = acc[None]                              # (1, 1, 128)


@jax.jit
def binary_focal_loss(output, target):
    """output: float logits, any shape; target: same shape, labels in {0,1}."""
    count = output.size                                       # static under jit
    x = output.reshape(-1)
    if x.dtype not in (jnp.float32, jnp.bfloat16):
        x = x.astype(jnp.float32)                             # widen exotic dtypes
    t = target.reshape(-1)                                    # native dtype, no copy

    R = pl.cdiv(count, LANES)
    pad = R * LANES - count
    if pad:
        # Only for non-128-aligned sizes; padded elements are masked in-kernel.
        x = jnp.pad(x, (0, pad))
        t = jnp.pad(t, (0, pad))
    x2 = x.reshape(R, LANES)
    t2 = t.reshape(R, LANES)

    # Tile selection: tile_r multiple of strip_r (and <= R for the large case),
    # partial last grid block handled by the in-kernel element mask.
    if R <= STRIP_R:
        tile_r = R                                            # full dim: always legal
        strip_r = R
    else:
        strip_r = STRIP_R
        tile_r = min(TILE_R, STRIP_R * (R // STRIP_R))
    num_tiles = pl.cdiv(R, tile_r)
    needs_mask = num_tiles * tile_r * LANES != count          # static

    kernel = functools.partial(_focal_kernel, count=count, tile_r=tile_r,
                               strip_r=strip_r, needs_mask=needs_mask)

    partials = pl.pallas_call(
        kernel,
        out_shape=jax.ShapeDtypeStruct((num_tiles, 1, LANES), jnp.float32),
        grid=(num_tiles,),
        in_specs=[
            pl.BlockSpec((tile_r, LANES), lambda i: (i, 0)),
            pl.BlockSpec((tile_r, LANES), lambda i: (i, 0)),
        ],
        out_specs=pl.BlockSpec((1, 1, LANES), lambda i: (i, 0, 0)),
        compiler_params=pltpu.CompilerParams(
            dimension_semantics=("parallel",),
            vmem_limit_bytes=32 * 1024 * 1024),
    )(x2, t2)

    # reduction='mean' over every element of the original tensor.
    return jnp.sum(partials) / count


def binary_focal_loss_ref(output, target, alpha=ALPHA, gamma=GAMMA,
                          smooth=SMOOTH):
    """Pure-JAX reference mirroring the PyTorch forward (defaults)."""
    x = output.astype(jnp.float32)
    prob = jax.nn.sigmoid(x)
    prob = jnp.clip(prob, smooth, 1.0 - smooth)
    pos_mask = (target == 1).astype(jnp.float32)
    neg_mask = (target == 0).astype(jnp.float32)
    pos_loss = -(pos_mask * (1.0 - prob) ** gamma) * jnp.log(prob)
    neg_loss = -alpha * (neg_mask * prob ** gamma) * jax.nn.log_sigmoid(-x)
    return jnp.mean(pos_loss + neg_loss)


if __name__ == "__main__":
    key = jax.random.PRNGKey(0)

    # Main check: lane-aligned NCHW-style logits/labels.
    k1, k2, k3, k4 = jax.random.split(key, 4)
    N, C, H, W = 2, 4, 16, 16
    output = jax.random.normal(k1, (N, C, H, W), dtype=jnp.float32) * 3.0
    target = jax.random.randint(k2, (N, C, H, W), 0, 2, dtype=jnp.int32)
    got = jax.block_until_ready(binary_focal_loss(output, target))
    ref = binary_focal_loss_ref(output, target)
    assert jnp.allclose(got, ref, atol=1e-5, rtol=1e-5), (got, ref)

    # Second check: non-128-aligned size exercising the in-kernel tail mask.
    out2 = jax.random.normal(k3, (3, 7, 9), dtype=jnp.float32) * 3.0
    tgt2 = jax.random.randint(k4, (3, 7, 9), 0, 2, dtype=jnp.int32)
    got2 = jax.block_until_ready(binary_focal_loss(out2, tgt2))
    ref2 = binary_focal_loss_ref(out2, tgt2)
    assert jnp.allclose(got2, ref2, atol=1e-5, rtol=1e-5), (got2, ref2)

    print("KERNEL_OK")
</pallas_src>

<mosaic_0001>
module attributes {stable_mosaic.version = 11 : i64} {
  func.func @_focal_kernel(%arg0: i32, %arg1: memref<16x128xf32, #tpu.memory_space<vmem>>, %arg2: memref<16x128xi32, #tpu.memory_space<vmem>>, %arg3: memref<1x1x128xf32, #tpu.memory_space<vmem>>) attributes {dimension_semantics = [#tpu.dimension_semantics<parallel>], iteration_bounds = array<i64: 1>, scalar_prefetch = 0 : i64, scratch_operands = 0 : i64, tpu.core_type = #tpu.core_type<tc>, window_params = [{transform_indices = @transform_0, window_bounds = array<i64: 16, 128>}, {transform_indices = @transform_1, window_bounds = array<i64: 16, 128>}, {transform_indices = @transform_2, window_bounds = array<i64: 1, 1, 128>}]} {
    %cst = arith.constant 0.000000e+00 : f32
    %0 = vector.broadcast %cst : f32 to vector<1x128xf32>
    %c0_i32 = arith.constant 0 : i32
    %c16_i32 = arith.constant 16 : i32
    %1 = arith.muli %c0_i32, %c16_i32 : i32
    %2 = tpu.assume_multiple %1, 16 : i32
    %3 = arith.index_cast %2 : i32 to index
    %c0 = arith.constant 0 : index
    %4 = vector.load %arg1[%3, %c0] : memref<16x128xf32, #tpu.memory_space<vmem>>, vector<16x128xf32>
    %5 = arith.index_cast %2 : i32 to index
    %c0_0 = arith.constant 0 : index
    %6 = vector.load %arg2[%5, %c0_0] : memref<16x128xi32, #tpu.memory_space<vmem>>, vector<16x128xi32>
    %7 = math.absf %4 : vector<16x128xf32>
    %cst_1 = arith.constant 0.000000e+00 : f32
    %8 = vector.broadcast %cst_1 : f32 to vector<16x128xf32>
    %9 = arith.subf %8, %7 : vector<16x128xf32>
    %10 = math.exp %9 : vector<16x128xf32>
    %11 = math.log1p %10 : vector<16x128xf32>
    %cst_2 = arith.constant 1.000000e+00 : f32
    %12 = vector.broadcast %cst_2 : f32 to vector<16x128xf32>
    %13 = arith.addf %12, %10 : vector<16x128xf32>
    %cst_3 = arith.constant 1.000000e+00 : f32
    %14 = vector.broadcast %cst_3 : f32 to vector<16x128xf32>
    %15 = arith.divf %14, %13 : vector<16x128xf32>
    %cst_4 = arith.constant 0.000000e+00 : f32
    %16 = vector.broadcast %cst_4 : f32 to vector<16x128xf32>
    %17 = arith.cmpf oge, %4, %16 : vector<16x128xf32>
    %18 = arith.mulf %10, %15 : vector<16x128xf32>
    %19 = arith.select %17, %15, %18 : vector<16x128xi1>, vector<16x128xf32>
    %cst_5 = arith.constant 9.99999997E-7 : f32
    %cst_6 = arith.constant 0.999998986 : f32
    %20 = vector.broadcast %cst_5 : f32 to vector<16x128xf32>
    %21 = arith.maximumf %20, %19 : vector<16x128xf32>
    %22 = vector.broadcast %cst_6 : f32 to vector<16x128xf32>
    %23 = arith.minimumf %22, %21 : vector<16x128xf32>
    %cst_7 = arith.constant 0.000000e+00 : f32
    %24 = vector.broadcast %cst_7 : f32 to vector<16x128xf32>
    %25 = arith.minimumf %4, %24 : vector<16x128xf32>
    %26 = arith.subf %25, %11 : vector<16x128xf32>
    %cst_8 = arith.constant -13.8155107 : f32
    %cst_9 = arith.constant -1.00000045E-6 : f32
    %27 = vector.broadcast %cst_8 : f32 to vector<16x128xf32>
    %28 = arith.maximumf %27, %26 : vector<16x128xf32>
    %29 = vector.broadcast %cst_9 : f32 to vector<16x128xf32>
    %30 = arith.minimumf %29, %28 : vector<16x128xf32>
    %cst_10 = arith.constant 0.000000e+00 : f32
    %31 = vector.broadcast %cst_10 : f32 to vector<16x128xf32>
    %32 = arith.maximumf %4, %31 : vector<16x128xf32>
    %33 = arith.addf %32, %11 : vector<16x128xf32>
    %cst_11 = arith.constant 1.000000e+00 : f32
    %34 = vector.broadcast %cst_11 : f32 to vector<16x128xf32>
    %35 = arith.subf %34, %23 : vector<16x128xf32>
    %36 = arith.mulf %35, %35 : vector<16x128xf32>
    %cst_12 = arith.constant 0.000000e+00 : f32
    %37 = vector.broadcast %cst_12 : f32 to vector<16x128xf32>
    %38 = arith.subf %37, %36 : vector<16x128xf32>
    %39 = arith.mulf %38, %30 : vector<16x128xf32>
    %40 = arith.mulf %23, %23 : vector<16x128xf32>
    %cst_13 = arith.constant 3.000000e+00 : f32
    %41 = vector.broadcast %cst_13 : f32 to vector<16x128xf32>
    %42 = arith.mulf %41, %40 : vector<16x128xf32>
    %43 = arith.mulf %42, %33 : vector<16x128xf32>
    %c1_i32 = arith.constant 1 : i32
    %44 = vector.broadcast %c1_i32 : i32 to vector<16x128xi32>
    %45 = arith.cmpi eq, %6, %44 : vector<16x128xi32>
    %c0_i32_14 = arith.constant 0 : i32
    %46 = vector.broadcast %c0_i32_14 : i32 to vector<16x128xi32>
    %47 = arith.cmpi eq, %6, %46 : vector<16x128xi32>
    %cst_15 = arith.constant 0.000000e+00 : f32
    %48 = vector.broadcast %cst_15 : f32 to vector<16x128xf32>
    %49 = arith.select %47, %43, %48 : vector<16x128xi1>, vector<16x128xf32>
    %50 = arith.select %45, %39, %49 : vector<16x128xi1>, vector<16x128xf32>
    %cst_16 = arith.constant dense<0.000000e+00> : vector<128xf32>
    %51 = vector.multi_reduction <add>, %50, %cst_16 [0] : vector<16x128xf32> to vector<128xf32>
    %52 = vector.shape_cast %51 : vector<128xf32> to vector<1x128xf32>
    %53 = arith.addf %0, %52 : vector<1x128xf32>
    %c1_i32_17 = arith.constant 1 : i32
    %54 = vector.shape_cast %53 : vector<1x128xf32> to vector<1x1x128xf32>
    %c0_18 = arith.constant 0 : index
    %c0_19 = arith.constant 0 : index
    %c0_20 = arith.constant 0 : index
    %55 = vector.load %arg3[%c0_18, %c0_19, %c0_20] : memref<1x1x128xf32, #tpu.memory_space<vmem>>, vector<1x1x128xf32>
    tpu.vector_store %arg3[%c0_18, %c0_19, %c0_20], %54 {strides = array<i32>} : memref<1x1x128xf32, #tpu.memory_space<vmem>>, vector<1x1x128xf32>,
    return
  }
  func.func @transform_0(%arg0: i32) -> (i32, i32) {
    %c0_i32 = arith.constant 0 : i32
    %c0_i32_0 = arith.constant 0 : i32
    return %arg0, %c0_i32 : i32, i32
  }
  func.func @transform_1(%arg0: i32) -> (i32, i32) {
    %c0_i32 = arith.constant 0 : i32
    %c0_i32_0 = arith.constant 0 : i32
    return %arg0, %c0_i32 : i32, i32
  }
  func.func @transform_2(%arg0: i32) -> (i32, i32, i32) {
    %c0_i32 = arith.constant 0 : i32
    %c0_i32_0 = arith.constant 0 : i32
    %c0_i32_1 = arith.constant 0 : i32
    return %arg0, %c0_i32, %c0_i32_0 : i32, i32, i32
  }
}

</mosaic_0001>

<bundles_post_ra>
// kernel: binary_focal_loss.1
= control target key start
LH: loop header
LB: loop body
LE: loop exit
PB: predicated region body
PF: predicated region fallthrough
CT: control target
= control target key end

     0   :  { %s146_s0 = inlined_call_operand.vmem [shape: f32[16,128], index: 0, kind: input, shape index: {}]   ;;  %s147_s1 = inlined_call_operand.vmem [shape: s32[16,128], index: 1, kind: input, shape index: {}]   ;;  %s148_s2 = inlined_call_operand.vmem [shape: f32[1,1,128], index: 2, kind: output, shape index: {}]  }
   0x1   :  { %v11_v0 = vld [vmem:[%s146_s0] sm:$0xff]  ;;  %v12_v1 = vld [vmem:[%s146_s0 + $0x8] sm:$0xff] }
   0x2   :  { %v15_v2 = vand.u32 2147483647, %v11_v0  ;;  %v16_v3 = vand.u32 2147483647, %v12_v1  ;;  %v57_v21 = vmin.f32 %v11_v0, 0.0  ;;  %v58_v24 = vmin.f32 %v12_v1, 0.0 }
   0x3   :  { %vm47_vm2 = vcmp.ge.f32.partialorder %v11_v0, 0.0  ;;  %vm48_vm3 = vcmp.ge.f32.partialorder %v12_v1, 0.0  ;;  %v65_v37 = vmax.f32 %v11_v0, 0.0  ;;  %v66_v39 = vmax.f32 %v12_v1, 0.0  ;;  %v13_v44 = vld [vmem:[%s147_s1] sm:$0xff]  ;;  %v14_v48 = vld [vmem:[%s147_s1 + $0x8] sm:$0xff] }
   0x4   :  { %v17_v4 = vsub.f32 0.0, %v15_v2  ;;  %v18_v5 = vsub.f32 0.0, %v16_v3  ;;  %vm85_vm4 = vcmp.eq.s32.totalorder %v13_v44, 0  ;;  %vm86_vm5 = vcmp.eq.s32.totalorder %v14_v48, 0 }
   0x5   :  { %vm83_vm6 = vcmp.eq.s32.totalorder %v13_v44, 1  ;;  %vm84_vm7 = vcmp.eq.s32.totalorder %v14_v48, 1 }
   0x6   :  { %v19_v6 = vmul.f32 1.442695, %v17_v4  ;;  %v21_v7 = vmul.f32 1.442695, %v18_v5 }
   0x8   :  { %104 = vpow2.f32 %v19_v6 }
   0x9   :  { %106 = vpow2.f32 %v21_v7 }
  0x12   :  { %v105_v8 = vpop.eup %104 }
  0x13   :  { %v107_v9 = vpop.eup %106  ;;  %v23_v10 = vadd.f32 1.0, %v105_v8  ;;  %v26_v12 = vmul.f32 -0.5, %v105_v8  ;;  %v29_v15 = vand.u32 2147483647, %v105_v8 }
  0x14   :  { %v32_v11 = vadd.f32 1.0, %v107_v9  ;;  %v35_v13 = vmul.f32 -0.5, %v107_v9  ;;  %v38_v17 = vand.u32 2147483647, %v107_v9 }
  0x15   :  { %108 = vlog2.f32 %v23_v10  ;;  %v27_v14 = vadd.f32 1.0, %v26_v12  ;;  %vm30_vm0 = vcmp.lt.f32.partialorder %v29_v15, 0.0004427343 }
  0x16   :  { %110 = vlog2.f32 %v32_v11  ;;  %v36_v16 = vadd.f32 1.0, %v35_v13  ;;  %vm39_vm1 = vcmp.lt.f32.partialorder %v38_v17, 0.0004427343 }
  0x17   :  { %112 = vrcp.f32 %v23_v10  ;;  %v28_v18 = vmul.f32 %v105_v8, %v27_v14 }
  0x18   :  { %114 = vrcp.f32 %v32_v11  ;;  %v37_v20 = vmul.f32 %v107_v9, %v36_v16 }
  0x1f   :  { %v109_v19 = vpop.eup %108 }
  0x20   :  { %v111_v22 = vpop.eup %110  ;;  %v25_v23 = vmul.f32 0.6931472, %v109_v19 }
  0x21   :  { %v113_v25 = vpop.eup %112  ;;  %v34_v26 = vmul.f32 0.6931472, %v111_v22 }
  0x22   :  { %v115_v27 = vpop.eup %114  ;;  %v31_v28 = vsel %vm30_vm0, %v28_v18, %v25_v23  ;;  %v49_v29 = vmul.f32 %v113_v25, %v105_v8 }
  0x23   :  { %v40_v30 = vsel %vm39_vm1, %v37_v20, %v34_v26  ;;  %v50_v31 = vmul.f32 %v115_v27, %v107_v9  ;;  %v59_v32 = vsub.f32 %v57_v21, %v31_v28  ;;  %v67_v45 = vadd.f32 %v65_v37, %v31_v28 }
  0x24   :  { %v51_v33 = vsel %vm47_vm2, %v113_v25, %v49_v29  ;;  %v60_v34 = vsub.f32 %v58_v24, %v40_v30  ;;  %v68_v49 = vadd.f32 %v66_v39, %v40_v30 }
  0x25   :  { %v52_v35 = vsel %vm48_vm3, %v115_v27, %v50_v31  ;;  %v53_v36 = vmax.f32 %v51_v33, 1e-06  ;;  %v61_v41 = vmax.f32 %v59_v32, -13.815511 }
  0x26   :  { %v54_v38 = vmax.f32 %v52_v35, 1e-06  ;;  %v62_v43 = vmax.f32 %v60_v34, -13.815511 }
  0x27   :  { %v55_v40 = vmin.f32 %v53_v36, 0.999999  ;;  %v63_v52 = vmin.f32 %v61_v41, -1.0000005e-06 }
  0x28   :  { %v56_v42 = vmin.f32 %v54_v38, 0.999999  ;;  %v64_v55 = vmin.f32 %v62_v43, -1.0000005e-06 }
  0x29   :  { %v69_v46 = vsub.f32 1.0, %v55_v40  ;;  %v77_v47 = vmul.f32 %v55_v40, %v55_v40 }
  0x2a   :  { %v70_v50 = vsub.f32 1.0, %v56_v42  ;;  %v78_v51 = vmul.f32 %v56_v42, %v56_v42 }
  0x2b   :  { %v71_v53 = vmul.f32 %v69_v46, %v69_v46  ;;  %v79_v54 = vmul.f32 3.0, %v77_v47 }
  0x2c   :  { %v72_v56 = vmul.f32 %v70_v50, %v70_v50  ;;  %v80_v57 = vmul.f32 3.0, %v78_v51 }
  0x2d   :  { %v73_v58 = vsub.f32 0.0, %v71_v53  ;;  %v81_v59 = vmul.f32 %v79_v54, %v67_v45 }
  0x2e   :  { %v74_v60 = vsub.f32 0.0, %v72_v56  ;;  %v82_v61 = vmul.f32 %v80_v57, %v68_v49 }
  0x2f   :  { %v75_v62 = vmul.f32 %v73_v58, %v63_v52  ;;  %v87_v63 = vsel %vm85_vm4, %v81_v59, 0.0 }
  0x30   :  { %v76_v0 = vmul.f32 %v74_v60, %v64_v55  ;;  %v88_v1 = vsel %vm86_vm5, %v82_v61, 0.0 }
  0x31   :  { %v89_v2 = vsel %vm83_vm6, %v75_v62, %v87_v63 }
  0x32   :  { %v90_v3 = vsel %vm84_vm7, %v76_v0, %v88_v1 }
  0x33   :  { %v91_v4 = vadd.f32 %v90_v3, %v89_v2 }
  0x35   :  { %v92_v5 = vrot.slane %v91_v4, 4 }
  0x37   :  { %v93_v6 = vadd.f32 %v92_v5, %v91_v4 }
  0x39   :  { %v94_v7 = vrot.slane %v93_v6, 2 }
  0x3b   :  { %v95_v8 = vadd.f32 %v94_v7, %v93_v6 }
  0x3d   :  { %v96_v9 = vrot.slane %v95_v8, 1 }
  0x3f   :  { %v97_v10 = vadd.f32 %v96_v9, %v95_v8 }
  0x41   :  { %99 = vst [vmem:[%s148_s2] sm:$0x1] %v97_v10 }

</bundles_post_ra>
